<compile_context>
chip_gen: v7x
topology: tpu7x:2x2x1
jax: 0.10.0
libtpu: 0.0.40
codegen_flags: <defaults>
</compile_context>

<pallas_src>
import math
import functools

import jax
import jax.numpy as jnp
from jax import lax
from jax.experimental import pallas as pl
from jax.experimental.pallas import tpu as pltpu


# ----------------------------------------------------------------------------
# Generation-aware VMEM budget and tile selection
# ----------------------------------------------------------------------------
@functools.lru_cache(maxsize=None)
def _vmem_limit_bytes():
    """~3/4 of physical VMEM: ~96 MiB on v5e/v6e (128 MiB), ~48 MiB on v7x (64 MiB)."""
    cap = 64 * 1024 * 1024
    try:
        info = pltpu.get_tpu_info()
        v = getattr(info, "vmem_capacity_bytes", None)
        if v:
            cap = int(v)
    except Exception:
        pass
    return int(min(cap * 3 // 4, 110 * 1024 * 1024))


def _pick_tile(dim, preferred):
    """Largest 128-aligned tile <= preferred dividing dim (else full dim)."""
    if dim <= preferred:
        return dim
    t = preferred
    while t >= 128:
        if dim % t == 0:
            return t
        t -= 128
    return dim  # TODO(synk): pad + mask instead of an untiled axis.


# ----------------------------------------------------------------------------
# Kernel 1: dense layer  y = x @ W^T + b   (W in torch layout (d_out, d_in))
#   Preferred path: K axis NOT tiled (tk = d_in) -> no accumulator RMW, both
#   grid axes parallel.  K-tiled accumulator kernel kept as large-d_in fallback.
# ----------------------------------------------------------------------------
def _linear_kernel_fullk(x_ref, w_ref, b_ref, o_ref):
    acc = lax.dot_general(x_ref[...], w_ref[...], (((1,), (1,)), ((), ())),
                          preferred_element_type=jnp.float32)
    o_ref[...] = (acc + b_ref[...]).astype(o_ref.dtype)


def _linear_kernel_ktiled(x_ref, w_ref, b_ref, o_ref, acc_ref):
    k_idx = pl.program_id(2)

    @pl.when(k_idx == 0)
    def _():
        acc_ref[...] = jnp.zeros_like(acc_ref)

    acc_ref[...] += lax.dot_general(x_ref[...], w_ref[...], (((1,), (1,)), ((), ())),
                                    preferred_element_type=jnp.float32)

    @pl.when(k_idx == pl.num_programs(2) - 1)
    def _():
        o_ref[...] = (acc_ref[...] + b_ref[...]).astype(o_ref.dtype)


def pallas_linear(x2d_bf16, w_bf16, b_f32, *, out_dtype=jnp.float32):
    """x2d_bf16: (M, d_in) bf16; w_bf16: (d_out, d_in) bf16; b_f32: (d_out,) f32."""
    M, d_in = x2d_bf16.shape
    d_out = w_bf16.shape[0]
    tm = _pick_tile(M, 256)
    tn = _pick_tile(d_out, 256)
    b2 = b_f32.reshape(1, d_out)
    vlim = _vmem_limit_bytes()

    out_bytes = jnp.dtype(out_dtype).itemsize
    fullk_bytes = 2 * ((tm + tn) * d_in * 2 + tm * tn * out_bytes + tn * 4)
    if fullk_bytes <= vlim // 2:
        return pl.pallas_call(
            _linear_kernel_fullk,
            out_shape=jax.ShapeDtypeStruct((M, d_out), out_dtype),
            grid_spec=pltpu.PrefetchScalarGridSpec(
                num_scalar_prefetch=0,
                grid=(M // tm, d_out // tn),
                in_specs=[
                    pl.BlockSpec((tm, d_in), lambda i, j: (i, 0)),
                    pl.BlockSpec((tn, d_in), lambda i, j: (j, 0)),
                    pl.BlockSpec((1, tn), lambda i, j: (0, j)),
                ],
                out_specs=pl.BlockSpec((tm, tn), lambda i, j: (i, j)),
            ),
            compiler_params=pltpu.CompilerParams(
                dimension_semantics=("parallel", "parallel"),
                vmem_limit_bytes=vlim,
            ),
        )(x2d_bf16, w_bf16, b2)

    # Fallback for very large d_in: K-tiled with f32 VMEM accumulator.
    tk = _pick_tile(d_in, 512)
    return pl.pallas_call(
        _linear_kernel_ktiled,
        out_shape=jax.ShapeDtypeStruct((M, d_out), out_dtype),
        grid_spec=pltpu.PrefetchScalarGridSpec(
            num_scalar_prefetch=0,
            grid=(M // tm, d_out // tn, d_in // tk),
            in_specs=[
                pl.BlockSpec((tm, tk), lambda i, j, k: (i, k)),
                pl.BlockSpec((tn, tk), lambda i, j, k: (j, k)),
                pl.BlockSpec((1, tn), lambda i, j, k: (0, j)),
            ],
            out_specs=pl.BlockSpec((tm, tn), lambda i, j, k: (i, j)),
            scratch_shapes=[pltpu.VMEM((tm, tn), jnp.float32)],
        ),
        compiler_params=pltpu.CompilerParams(
            dimension_semantics=("parallel", "parallel", "arbitrary"),
            vmem_limit_bytes=vlim,
        ),
    )(x2d_bf16, w_bf16, b2)


# ----------------------------------------------------------------------------
# Kernel 2: fused Q/K/V projection.  Activation read from HBM once; the three
#   weights are fully VMEM-resident (block index constant -> DMA'd once).
# ----------------------------------------------------------------------------
def _qkv_kernel(x_ref, wq_ref, wk_ref, wv_ref, b_ref, q_out, k_out, v_out):
    x = x_ref[...]                                   # (tm, d_in) bf16
    dn = (((1,), (1,)), ((), ()))
    q_out[...] = (lax.dot_general(x, wq_ref[...], dn, preferred_element_type=jnp.float32)
                  + b_ref[0:1, :]).astype(q_out.dtype)
    k_out[...] = (lax.dot_general(x, wk_ref[...], dn, preferred_element_type=jnp.float32)
                  + b_ref[1:2, :]).astype(k_out.dtype)
    v_out[...] = (lax.dot_general(x, wv_ref[...], dn, preferred_element_type=jnp.float32)
                  + b_ref[2:3, :]).astype(v_out.dtype)


def pallas_qkv_linear(x2d_bf16, wq, wk, wv, b_stack):
    """x2d_bf16: (M, d_in) bf16; wq/wk/wv: (d_out, d_in) bf16; b_stack: (3, d_out) f32."""
    M, d_in = x2d_bf16.shape
    d_out = wq.shape[0]
    tm = _pick_tile(M, 256)
    vlim = _vmem_limit_bytes()

    # weights (double-buffered by the pipeline but fetched once) + x/out tiles
    resident_bytes = 2 * (3 * d_out * d_in * 2 + tm * d_in * 2
                          + 3 * tm * d_out * 2 + 3 * d_out * 4)
    if resident_bytes > (vlim * 3) // 4:
        # TODO(synk): K-tiled fused QKV for very large d_model; falls back to
        # three GEMMs that each re-read the activation.
        q = pallas_linear(x2d_bf16, wq, b_stack[0], out_dtype=jnp.bfloat16)
        k = pallas_linear(x2d_bf16, wk, b_stack[1], out_dtype=jnp.bfloat16)
        v = pallas_linear(x2d_bf16, wv, b_stack[2], out_dtype=jnp.bfloat16)
        return q, k, v

    out_sd = jax.ShapeDtypeStruct((M, d_out), jnp.bfloat16)
    out_spec = pl.BlockSpec((tm, d_out), lambda i: (i, 0))
    w_spec = pl.BlockSpec((d_out, d_in), lambda i: (0, 0))
    return pl.pallas_call(
        _qkv_kernel,
        out_shape=(out_sd, out_sd, out_sd),
        grid_spec=pltpu.PrefetchScalarGridSpec(
            num_scalar_prefetch=0,
            grid=(M // tm,),
            in_specs=[
                pl.BlockSpec((tm, d_in), lambda i: (i, 0)),
                w_spec, w_spec, w_spec,
                pl.BlockSpec((3, d_out), lambda i: (0, 0)),
            ],
            out_specs=[out_spec, out_spec, out_spec],
        ),
        compiler_params=pltpu.CompilerParams(
            dimension_semantics=("parallel",),
            vmem_limit_bytes=vlim,
        ),
    )(x2d_bf16, wq, wk, wv, b_stack)


# ----------------------------------------------------------------------------
# Kernel 3: flash-style scaled-dot-product attention.
#   Layout stays (B, S, d_model) end-to-end; heads are static lane slices.
#   Grid = (B, Sq_tiles, Sk_tiles); Sk is the innermost "arbitrary" axis and
#   streams K/V tiles through VMEM with an online softmax.  Output is one
#   lane-dense (tq, d_model) store per q-tile.
# ----------------------------------------------------------------------------
def _attention_kernel(q_ref, k_ref, v_ref, bias_ref, o_ref,
                      m_sc, l_sc, acc_sc, *, h, d_k):
    kj = pl.program_id(2)

    @pl.when(kj == 0)
    def _():
        m_sc[...] = jnp.full_like(m_sc, -jnp.inf)
        l_sc[...] = jnp.zeros_like(l_sc)
        acc_sc[...] = jnp.zeros_like(acc_sc)

    bias = bias_ref[0]                           # (1, tk) f32 additive mask bias

    for head in range(h):                        # static unroll; intermediates die per head
        lo = head * d_k
        q = q_ref[0, :, lo:lo + d_k]             # (tq, d_k) bf16; 1/sqrt(d_k) folded into Wq
        k = k_ref[0, :, lo:lo + d_k]             # (tk, d_k) bf16
        v = v_ref[0, :, lo:lo + d_k]             # (tk, d_k) bf16

        s = lax.dot_general(q, k, (((1,), (1,)), ((), ())),
                            preferred_element_type=jnp.float32)      # (tq, tk)
        s = s + bias

        m_prev = m_sc[head]                                           # (tq, 1)
        m_new = jnp.maximum(m_prev, jnp.max(s, axis=-1, keepdims=True))
        alpha = jnp.exp(m_prev - m_new)
        p = jnp.exp(s - m_new)
        l_sc[head] = alpha * l_sc[head] + jnp.sum(p, axis=-1, keepdims=True)
        acc_sc[:, lo:lo + d_k] = (alpha * acc_sc[:, lo:lo + d_k]
                                  + jnp.dot(p.astype(jnp.bfloat16), v,
                                            preferred_element_type=jnp.float32))
        m_sc[head] = m_new

    @pl.when(kj == pl.num_programs(2) - 1)
    def _():
        outs = []
        for head in range(h):
            inv = pl.reciprocal(l_sc[head], approx=True)              # (tq, 1)
            outs.append(acc_sc[:, head * d_k:(head + 1) * d_k] * inv)
        # single lane-dense (tq, d_model) store
        o_ref[0, :, :] = jnp.concatenate(outs, axis=-1).astype(o_ref.dtype)


def pallas_attention(q, k, v, bias, *, h):
    """q: (B, Sq, d_model) bf16; k,v: (B, Sk, d_model) bf16; bias: (B, 1, Sk) f32."""
    B, Sq, d_model = q.shape
    Sk = k.shape[1]
    d_k = d_model // h
    tq = _pick_tile(Sq, 256)       # keep >= 256 where possible to fill the MXU
    tk = _pick_tile(Sk, 512)       # K/V streamed in tk-sized tiles (online softmax)
    vlim = _vmem_limit_bytes()
    kernel = functools.partial(_attention_kernel, h=h, d_k=d_k)

    return pl.pallas_call(
        kernel,
        out_shape=jax.ShapeDtypeStruct((B, Sq, d_model), jnp.bfloat16),
        grid_spec=pltpu.PrefetchScalarGridSpec(
            num_scalar_prefetch=0,
            grid=(B, Sq // tq, Sk // tk),
            in_specs=[
                pl.BlockSpec((1, tq, d_model), lambda b, qi, kj: (b, qi, 0)),
                pl.BlockSpec((1, tk, d_model), lambda b, qi, kj: (b, kj, 0)),
                pl.BlockSpec((1, tk, d_model), lambda b, qi, kj: (b, kj, 0)),
                pl.BlockSpec((1, 1, tk), lambda b, qi, kj: (b, 0, kj)),
            ],
            out_specs=pl.BlockSpec((1, tq, d_model), lambda b, qi, kj: (b, qi, 0)),
            scratch_shapes=[
                pltpu.VMEM((h, tq, 1), jnp.float32),     # running max per head
                pltpu.VMEM((h, tq, 1), jnp.float32),     # running denom per head
                pltpu.VMEM((tq, d_model), jnp.float32),  # lane-dense output accumulator
            ],
        ),
        compiler_params=pltpu.CompilerParams(
            dimension_semantics=("parallel", "parallel", "arbitrary"),
            vmem_limit_bytes=vlim,
        ),
    )(q, k, v, bias)


# ----------------------------------------------------------------------------
# Module wrapper (glue: reshapes + one bf16 cast — no transposes, no copies)
# ----------------------------------------------------------------------------
def init_mha_params(key, d_model):
    """4 linear layers (W: (d_model, d_model) torch layout, b: (d_model,))."""
    params = []
    bound = 1.0 / math.sqrt(d_model)
    for i in range(4):
        kw, kb = jax.random.split(jax.random.fold_in(key, i))
        w = jax.random.uniform(kw, (d_model, d_model), jnp.float32, -bound, bound)
        b = jax.random.uniform(kb, (d_model,), jnp.float32, -bound, bound)
        params.append((w, b))
    return params


def multi_head_attention(params, h, query, key, value, mask=None):
    """query/key/value: (B, S, d_model) f32; mask: (B, 1, Sk) int or None."""
    B, Sq, d_model = query.shape
    Sk = key.shape[1]
    assert d_model % h == 0
    d_k = d_model // h
    scale = 1.0 / math.sqrt(d_k)

    (wq, bq), (wk, bk), (wv, bv), (wo, bo) = params
    # Fold 1/sqrt(d_k) into the Q projection (weight AND bias).
    wq_b = (wq * scale).astype(jnp.bfloat16)
    bq_s = (bq * scale).astype(jnp.float32)
    wk_b = wk.astype(jnp.bfloat16)
    wv_b = wv.astype(jnp.bfloat16)
    wo_b = wo.astype(jnp.bfloat16)

    # Additive mask bias (0 where attended, -1e9 where masked), computed once.
    if mask is None:
        bias = jnp.zeros((B, 1, Sk), jnp.float32)
    else:
        bias = jnp.where(mask.reshape(B, 1, Sk).astype(jnp.int32) == 0,
                         jnp.float32(-1e9), jnp.float32(0.0))

    if (query is key) and (key is value):
        # Self-attention: fused Q/K/V projection, activation cast to bf16 once.
        x_b = query.astype(jnp.bfloat16).reshape(B * Sq, d_model)
        q2d, k2d, v2d = pallas_qkv_linear(
            x_b, wq_b, wk_b, wv_b,
            jnp.stack([bq_s, bk.astype(jnp.float32), bv.astype(jnp.float32)]))
    else:
        q2d = pallas_linear(query.astype(jnp.bfloat16).reshape(B * Sq, d_model),
                            wq_b, bq_s, out_dtype=jnp.bfloat16)
        k2d = pallas_linear(key.astype(jnp.bfloat16).reshape(B * Sk, d_model),
                            wk_b, bk.astype(jnp.float32), out_dtype=jnp.bfloat16)
        v2d = pallas_linear(value.astype(jnp.bfloat16).reshape(B * Sk, d_model),
                            wv_b, bv.astype(jnp.float32), out_dtype=jnp.bfloat16)

    ctx = pallas_attention(q2d.reshape(B, Sq, d_model),
                           k2d.reshape(B, Sk, d_model),
                           v2d.reshape(B, Sk, d_model),
                           bias, h=h)                    # (B, Sq, d_model) bf16

    # TODO(synk): dropout on attention probabilities (eval-mode identity here).
    out = pallas_linear(ctx.reshape(B * Sq, d_model), wo_b,
                        bo.astype(jnp.float32), out_dtype=jnp.float32)
    return out.reshape(B, Sq, d_model)


# ----------------------------------------------------------------------------
# Pure-JAX f32 reference (same math) for a correctness check
# ----------------------------------------------------------------------------
def reference_mha(params, h, query, key, value, mask=None):
    B, Sq, d_model = query.shape
    Sk = key.shape[1]
    d_k = d_model // h
    if mask is None:
        mask = jnp.ones((B, 1, Sk), dtype=jnp.int32)

    def lin(x, wb):
        w, b = wb
        return x @ w.T + b

    def split(x):
        return x.reshape(B, -1, h, d_k).transpose(0, 2, 1, 3)

    q = split(lin(query, params[0]))
    k = split(lin(key, params[1]))
    v = split(lin(value, params[2]))
    scores = jnp.einsum("bhqd,bhkd->bhqk", q, k) / math.sqrt(d_k)
    scores = jnp.where(mask[:, None, :, :] == 0, -1e9, scores)
    p = jax.nn.softmax(scores, axis=-1)
    x = jnp.einsum("bhqk,bhkd->bhqd", p, v)
    x = x.transpose(0, 2, 1, 3).reshape(B, Sq, d_model)
    return lin(x, params[3])


if __name__ == "__main__":
    # Small shapes consistent with the module's forward pass.
    B, S, d_model, h = 2, 8, 32, 4

    root = jax.random.PRNGKey(0)
    kq, kk, kv, kp = jax.random.split(root, 4)
    x_self = jax.random.normal(kq, (B, S, d_model), dtype=jnp.float32)
    query = jax.random.normal(kq, (B, S, d_model), dtype=jnp.float32)
    key_t = jax.random.normal(kk, (B, S, d_model), dtype=jnp.float32)
    value = jax.random.normal(kv, (B, S, d_model), dtype=jnp.float32)

    # mask of shape (B, 1, S): mask out the last two key positions of batch 1.
    mask = jnp.ones((B, 1, S), dtype=jnp.int32)
    mask = mask.at[1, 0, -2:].set(0)

    params = init_mha_params(kp, d_model)

    # Tolerances are bf16-MXU limited (f32 accumulation, f32 softmax).
    TOL = dict(atol=5e-2, rtol=5e-2)

    # 1) self-attention (query is key is value) -> fused QKV projection kernel.
    out1 = jax.block_until_ready(
        multi_head_attention(params, h, x_self, x_self, x_self, mask))
    ref1 = reference_mha(params, h, x_self, x_self, x_self, mask)
    assert out1.shape == (B, S, d_model)
    assert jnp.allclose(out1, ref1, **TOL), "self-attention mismatch vs reference"

    # 2) distinct query/key/value -> separate projection kernels.
    out2 = jax.block_until_ready(
        multi_head_attention(params, h, query, key_t, value, mask))
    ref2 = reference_mha(params, h, query, key_t, value, mask)
    assert out2.shape == (B, S, d_model)
    assert jnp.allclose(out2, ref2, **TOL), "cross-attention mismatch vs reference"

    print("KERNEL_OK")
</pallas_src>

<mosaic_0001>
module attributes {stable_mosaic.version = 11 : i64} {
  func.func @_qkv_kernel(%arg0: i32, %arg1: memref<16x32xbf16, #tpu.memory_space<vmem>>, %arg2: memref<32x32xbf16, #tpu.memory_space<vmem>>, %arg3: memref<32x32xbf16, #tpu.memory_space<vmem>>, %arg4: memref<32x32xbf16, #tpu.memory_space<vmem>>, %arg5: memref<3x32xf32, #tpu.memory_space<vmem>>, %arg6: memref<16x32xbf16, #tpu.memory_space<vmem>>, %arg7: memref<16x32xbf16, #tpu.memory_space<vmem>>, %arg8: memref<16x32xbf16, #tpu.memory_space<vmem>>) attributes {dimension_semantics = [#tpu.dimension_semantics<parallel>], iteration_bounds = array<i64: 1>, scalar_prefetch = 0 : i64, scratch_operands = 0 : i64, tpu.core_type = #tpu.core_type<tc>, window_params = [{transform_indices = @transform_0, window_bounds = array<i64: 16, 32>}, {pipeline_mode = #tpu.pipeline_mode<synchronous>, transform_indices = @transform_1, window_bounds = array<i64: 32, 32>}, {pipeline_mode = #tpu.pipeline_mode<synchronous>, transform_indices = @transform_2, window_bounds = array<i64: 32, 32>}, {pipeline_mode = #tpu.pipeline_mode<synchronous>, transform_indices = @transform_3, window_bounds = array<i64: 32, 32>}, {pipeline_mode = #tpu.pipeline_mode<synchronous>, transform_indices = @transform_4, window_bounds = array<i64: 3, 32>}, {transform_indices = @transform_5, window_bounds = array<i64: 16, 32>}, {transform_indices = @transform_6, window_bounds = array<i64: 16, 32>}, {transform_indices = @transform_7, window_bounds = array<i64: 16, 32>}]} {
    %c0 = arith.constant 0 : index
    %c0_0 = arith.constant 0 : index
    %0 = vector.load %arg1[%c0, %c0_0] : memref<16x32xbf16, #tpu.memory_space<vmem>>, vector<16x32xbf16>
    %c0_1 = arith.constant 0 : index
    %c0_2 = arith.constant 0 : index
    %1 = vector.load %arg2[%c0_1, %c0_2] : memref<32x32xbf16, #tpu.memory_space<vmem>>, vector<32x32xbf16>
    %cst = arith.constant dense<0.000000e+00> : vector<16x32xf32>
    %2 = tpu.matmul %0, %1, %cst {dimension_numbers = #tpu.dot_dimension_numbers<[1], [1], [0], [0], [0, 0, 1, 0], [], []>} : vector<16x32xbf16>, vector<32x32xbf16>, vector<16x32xf32> -> vector<16x32xf32>
    %c0_3 = arith.constant 0 : index
    %c0_4 = arith.constant 0 : index
    %3 = vector.load %arg5[%c0_3, %c0_4] : memref<3x32xf32, #tpu.memory_space<vmem>>, vector<1x32xf32>
    %4 = vector.broadcast %3 : vector<1x32xf32> to vector<16x32xf32>
    %5 = arith.addf %2, %4 : vector<16x32xf32>
    %6 = arith.truncf %5 : vector<16x32xf32> to vector<16x32xbf16>
    %c0_5 = arith.constant 0 : index
    %c0_6 = arith.constant 0 : index
    %7 = vector.load %arg6[%c0_5, %c0_6] : memref<16x32xbf16, #tpu.memory_space<vmem>>, vector<16x32xbf16>
    tpu.vector_store %arg6[%c0_5, %c0_6], %6 {strides = array<i32>} : memref<16x32xbf16, #tpu.memory_space<vmem>>, vector<16x32xbf16>,
    %c0_7 = arith.constant 0 : index
    %c0_8 = arith.constant 0 : index
    %8 = vector.load %arg3[%c0_7, %c0_8] : memref<32x32xbf16, #tpu.memory_space<vmem>>, vector<32x32xbf16>
    %cst_9 = arith.constant dense<0.000000e+00> : vector<16x32xf32>
    %9 = tpu.matmul %0, %8, %cst_9 {dimension_numbers = #tpu.dot_dimension_numbers<[1], [1], [0], [0], [0, 0, 1, 0], [], []>} : vector<16x32xbf16>, vector<32x32xbf16>, vector<16x32xf32> -> vector<16x32xf32>
    %c1 = arith.constant 1 : index
    %c0_10 = arith.constant 0 : index
    %10 = vector.load %arg5[%c1, %c0_10] : memref<3x32xf32, #tpu.memory_space<vmem>>, vector<1x32xf32>
    %11 = vector.broadcast %10 : vector<1x32xf32> to vector<16x32xf32>
    %12 = arith.addf %9, %11 : vector<16x32xf32>
    %13 = arith.truncf %12 : vector<16x32xf32> to vector<16x32xbf16>
    %c0_11 = arith.constant 0 : index
    %c0_12 = arith.constant 0 : index
    %14 = vector.load %arg7[%c0_11, %c0_12] : memref<16x32xbf16, #tpu.memory_space<vmem>>, vector<16x32xbf16>
    tpu.vector_store %arg7[%c0_11, %c0_12], %13 {strides = array<i32>} : memref<16x32xbf16, #tpu.memory_space<vmem>>, vector<16x32xbf16>,
    %c0_13 = arith.constant 0 : index
    %c0_14 = arith.constant 0 : index
    %15 = vector.load %arg4[%c0_13, %c0_14] : memref<32x32xbf16, #tpu.memory_space<vmem>>, vector<32x32xbf16>
    %cst_15 = arith.constant dense<0.000000e+00> : vector<16x32xf32>
    %16 = tpu.matmul %0, %15, %cst_15 {dimension_numbers = #tpu.dot_dimension_numbers<[1], [1], [0], [0], [0, 0, 1, 0], [], []>} : vector<16x32xbf16>, vector<32x32xbf16>, vector<16x32xf32> -> vector<16x32xf32>
    %c2 = arith.constant 2 : index
    %c0_16 = arith.constant 0 : index
    %17 = vector.load %arg5[%c2, %c0_16] : memref<3x32xf32, #tpu.memory_space<vmem>>, vector<1x32xf32>
    %18 = vector.broadcast %17 : vector<1x32xf32> to vector<16x32xf32>
    %19 = arith.addf %16, %18 : vector<16x32xf32>
    %20 = arith.truncf %19 : vector<16x32xf32> to vector<16x32xbf16>
    %c0_17 = arith.constant 0 : index
    %c0_18 = arith.constant 0 : index
    %21 = vector.load %arg8[%c0_17, %c0_18] : memref<16x32xbf16, #tpu.memory_space<vmem>>, vector<16x32xbf16>
    tpu.vector_store %arg8[%c0_17, %c0_18], %20 {strides = array<i32>} : memref<16x32xbf16, #tpu.memory_space<vmem>>, vector<16x32xbf16>,
    return
  }
  func.func @transform_0(%arg0: i32) -> (i32, i32) {
    %c0_i32 = arith.constant 0 : i32
    %c0_i32_0 = arith.constant 0 : i32
    return %arg0, %c0_i32 : i32, i32
  }
  func.func @transform_1(%arg0: i32) -> (i32, i32) {
    %c0_i32 = arith.constant 0 : i32
    %c0_i32_0 = arith.constant 0 : i32
    %c0_i32_1 = arith.constant 0 : i32
    return %c0_i32, %c0_i32_0 : i32, i32
  }
  func.func @transform_2(%arg0: i32) -> (i32, i32) {
    %c0_i32 = arith.constant 0 : i32
    %c0_i32_0 = arith.constant 0 : i32
    %c0_i32_1 = arith.constant 0 : i32
    return %c0_i32, %c0_i32_0 : i32, i32
  }
  func.func @transform_3(%arg0: i32) -> (i32, i32) {
    %c0_i32 = arith.constant 0 : i32
    %c0_i32_0 = arith.constant 0 : i32
    %c0_i32_1 = arith.constant 0 : i32
    return %c0_i32, %c0_i32_0 : i32, i32
  }
  func.func @transform_4(%arg0: i32) -> (i32, i32) {
    %c0_i32 = arith.constant 0 : i32
    %c0_i32_0 = arith.constant 0 : i32
    %c0_i32_1 = arith.constant 0 : i32
    return %c0_i32, %c0_i32_0 : i32, i32
  }
  func.func @transform_5(%arg0: i32) -> (i32, i32) {
    %c0_i32 = arith.constant 0 : i32
    %c0_i32_0 = arith.constant 0 : i32
    return %arg0, %c0_i32 : i32, i32
  }
  func.func @transform_6(%arg0: i32) -> (i32, i32) {
    %c0_i32 = arith.constant 0 : i32
    %c0_i32_0 = arith.constant 0 : i32
    return %arg0, %c0_i32 : i32, i32
  }
  func.func @transform_7(%arg0: i32) -> (i32, i32) {
    %c0_i32 = arith.constant 0 : i32
    %c0_i32_0 = arith.constant 0 : i32
    return %arg0, %c0_i32 : i32, i32
  }
}

</mosaic_0001>

<bundles_post_ra>
// kernel: tpu_custom_call.1
= control target key start
LH: loop header
LB: loop body
LE: loop exit
PB: predicated region body
PF: predicated region fallthrough
CT: control target
= control target key end

     0   :  { %13 = vsyncpa [#allocation3], 0  ;;  %s815_s0 = inlined_call_operand.hbm [shape: bf16[16,32], index: 0, kind: input, shape index: {}]   ;;  %s816_s1 = inlined_call_operand.hbm [shape: bf16[32,32], index: 1, kind: input, shape index: {}]   ;;  %s817_s2 = inlined_call_operand.hbm [shape: bf16[32,32], index: 2, kind: input, shape index: {}]   ;;  %s818_s3 = inlined_call_operand.hbm [shape: bf16[32,32], index: 3, kind: input, shape index: {}]   ;;  %s819_s4 = inlined_call_operand.vmem [shape: f32[3,32], index: 4, kind: input, shape index: {}]   ;;  %s820_s5 = inlined_call_operand.hbm [shape: bf16[16,32], index: 5, kind: output, shape index: {0}]   ;;  %s821_s6 = inlined_call_operand.hbm [shape: bf16[16,32], index: 6, kind: output, shape index: {1}]   ;;  %s822_s7 = inlined_call_operand.hbm [shape: bf16[16,32], index: 7, kind: output, shape index: {2}]  }
   0x1   :  { %14 = vsyncpa [#allocation6], 0 }
   0x2   :  { %15 = vsyncpa [#allocation9], 0 }
   0x3   :  { %16 = vsyncpa [#allocation4], 0 }
   0x4   :  { %17 = vsyncpa [#allocation12], 0  ;;  %s611_s24 = smov [#allocation5]   ;;  %s612_s26 = smov [#allocation2]  }
   0x5   :  { %s35_s25 = sshll.u32 %s611_s24, 4  ;;  %s23_s27 = sshll.u32 %s612_s26, 4  ;;  %s36_s25 = int_to_ptr.vmem [resolvable:$true] %s35_s25  ;;  %s662_s27 = int_to_ptr.vmem [resolvable:$true] %s23_s27 }
   0x6   :  { %s447_s30 = scalar_lea.hbm %s816_s1, 256 }
   0x7   :  { %p448_p0 = scmp.ne.s32.totalorder %s816_s1, %s447_s30  ;;  %p451_p1 = scmp.lt.u32.totalorder %s447_s30, %s816_s1 }
   0x9   :  { %p453_p2 = pnand %p451_p1, %p448_p0 }
   0xb   :  { %456 = shalt.err (!%p453_p2)
}
   0xc   :  { %s457_s12 = scalar_lea.vmem %s36_s25, 256  ;;  %p462_p4 = scmp.lt.s32.totalorder %s36_s25, %s36_s25 }
   0xd   :  { %p458_p3 = scmp.ne.s32.totalorder %s36_s25, %s457_s12  ;;  %p463_p5 = scmp.lt.s32.totalorder %s457_s12, %s457_s12 }
   0xf   :  { %p464_p6 = por %p463_p5, %p462_p4 }
  0x11   :  { %p465_p7 = pnand %p464_p6, %p458_p3 }
  0x13   :  { %468 = shalt.err (!%p465_p7)
}
  0x14   :  { %s613_s13 = smov 64   ;;  %s614_s14 = smov 4  }
  0x15   :  { %41 = dma.hbm_to_vmem [thread:$0]  %s816_s1, 256, %s36_s25, [#allocation6], %s613_s13, %s613_s13, %s614_s14  }
  0x16   :  { %s469_s19 = scalar_lea.hbm %s815_s0, 128 }
  0x17   :  { %p470_p8 = scmp.ne.s32.totalorder %s815_s0, %s469_s19  ;;  %p473_p9 = scmp.lt.u32.totalorder %s469_s19, %s815_s0 }
  0x19   :  { %p475_p10 = pnand %p473_p9, %p470_p8 }
  0x1b   :  { %478 = shalt.err (!%p475_p10)
}
  0x1c   :  { %s479_s24 = scalar_lea.vmem %s662_s27, 128  ;;  %p484_p12 = scmp.lt.s32.totalorder %s662_s27, %s662_s27 }
  0x1d   :  { %p480_p11 = scmp.ne.s32.totalorder %s662_s27, %s479_s24  ;;  %p485_p13 = scmp.lt.s32.totalorder %s479_s24, %s479_s24 }
  0x1f   :  { %p486_p0 = por %p485_p13, %p484_p12 }
  0x21   :  { %p487_p1 = pnand %p486_p0, %p480_p11 }
  0x23   :  { %490 = shalt.err (!%p487_p1)
}
  0x24   :  { %29 = dma.hbm_to_vmem [thread:$0]  %s815_s0, 128, %s662_s27, [#allocation3], %s613_s13, %s613_s13, %s614_s14  }
  0x25   :  { %s615_s26 = smov [#allocation7]   ;;  %s616_s29 = smov [#allocation8]  }
  0x26   :  { %s47_s28 = sshll.u32 %s615_s26, 4  ;;  %s59_s30 = sshll.u32 %s616_s29, 4  ;;  %s48_s28 = int_to_ptr.vmem [resolvable:$true] %s47_s28  ;;  %s699_s30 = int_to_ptr.vmem [resolvable:$true] %s59_s30 }
  0x27   :  { %s491_s10 = scalar_lea.hbm %s817_s2, 256 }
  0x28   :  { %p492_p2 = scmp.ne.s32.totalorder %s817_s2, %s491_s10  ;;  %p495_p3 = scmp.lt.u32.totalorder %s491_s10, %s817_s2 }
  0x2a   :  { %p497_p4 = pnand %p495_p3, %p492_p2 }
  0x2c   :  { %500 = shalt.err (!%p497_p4)
}
  0x2d   :  { %s501_s0 = scalar_lea.vmem %s48_s28, 256  ;;  %p506_p6 = scmp.lt.s32.totalorder %s48_s28, %s48_s28 }
  0x2e   :  { %p502_p5 = scmp.ne.s32.totalorder %s48_s28, %s501_s0  ;;  %p507_p7 = scmp.lt.s32.totalorder %s501_s0, %s501_s0 }
  0x30   :  { %p508_p8 = por %p507_p7, %p506_p6 }
  0x32   :  { %p509_p9 = pnand %p508_p8, %p502_p5 }
  0x34   :  { %512 = shalt.err (!%p509_p9)
}
  0x35   :  { %53 = dma.hbm_to_vmem [thread:$0]  %s817_s2, 256, %s48_s28, [#allocation6], %s613_s13, %s613_s13, %s614_s14  }
  0x36   :  { %s513_s20 = scalar_lea.hbm %s818_s3, 256 }
  0x37   :  { %p514_p10 = scmp.ne.s32.totalorder %s818_s3, %s513_s20  ;;  %p517_p11 = scmp.lt.u32.totalorder %s513_s20, %s818_s3 }
  0x39   :  { %p519_p12 = pnand %p517_p11, %p514_p10 }
  0x3b   :  { %522 = shalt.err (!%p519_p12)
}
  0x3c   :  { %s523_s1 = scalar_lea.vmem %s699_s30, 256  ;;  %p528_p0 = scmp.lt.s32.totalorder %s699_s30, %s699_s30 }
  0x3d   :  { %p524_p13 = scmp.ne.s32.totalorder %s699_s30, %s523_s1  ;;  %p529_p1 = scmp.lt.s32.totalorder %s523_s1, %s523_s1 }
  0x3f   :  { %p530_p2 = por %p529_p1, %p528_p0 }
  0x41   :  { %p531_p3 = pnand %p530_p2, %p524_p13 }
  0x43   :  { %534 = shalt.err (!%p531_p3)
}
  0x44   :  { %65 = dma.hbm_to_vmem [thread:$0]  %s818_s3, 256, %s699_s30, [#allocation9], %s613_s13, %s613_s13, %s614_s14  }
  0x45   :  { %601 = dma.done.wait [#allocation3], 128  }
  0x46   :  { %602 = vsyncadd [#allocation3], 4294967168 }
  0x47   :  { %603 = dma.done.wait [#allocation6], 512  }
  0x48   :  { %604 = vsyncadd [#allocation6], 4294966784 }
  0x49   :  { %605 = dma.done.wait [#allocation9], 256  }
  0x4a   :  { %606 = vsyncadd [#allocation9], 4294967040  ;;  %v617_v0 = vmov 0.0   ;;  %vm618_vm0 = vmmov 0   ;;  %vm107_vm1 = vcmask 261120   ;;  %v440_v1 = vld [vmem:[#allocation5] sm:$0xff]  }
  0x4b   :  { %405 = vmatprep.subr.bf16.mxu0 %v617_v0  ;;  %413 = vmatprep.subr.bf16.mxu1 %v617_v0  ;;  %v112_v2 = vsel %vm107_vm1, %v440_v1, 0  ;;  %v442_v3 = vld [vmem:[#allocation7] sm:$0xff]   ;;  %v441_v4 = vld [vmem:[#allocation5 + $0x8] sm:$0xff]   ;;  %v445_v6 = vld [vmem:[#allocation7 + $0x8] sm:$0xff]   ;;  %vm166_vm2 = vcmask 257024   ;;  %s619_s30 = smov [#allocation10]  }
  0x4c   :  { %409 = vmatprep.mubr.msk.bf16.mxu0 %vm618_vm0, %v617_v0  ;;  %417 = vmatprep.mubr.msk.bf16.mxu1 %vm618_vm0, %v617_v0  ;;  %v189_v5 = vsel %vm107_vm1, %v442_v3, 0  ;;  %v115_v7 = vsel %vm107_vm1, %v441_v4, 0  ;;  %v192_v8 = vsel %vm107_vm1, %v445_v6, 0  ;;  %v444_v9 = vld [vmem:[#allocation8] sm:$0xff]   ;;  %v443_v10 = vld [vmem:[#allocation2] sm:$0xff]   ;;  %v446_v12 = vld [vmem:[#allocation8 + $0x8] sm:$0xff]  }
  0x4d   :  { %406 = vmatpush3.bf16.xpose.msra.mxu0 %v112_v2  ;;  %414 = vmatpush3.bf16.xpose.msra.mxu1 %v189_v5  ;;  %v265_v11 = vsel %vm107_vm1, %v444_v9, 0  ;;  %v268_v13 = vsel %vm107_vm1, %v446_v12, 0  ;;  %v371_v14 = vld [vmem:[%s819_s4] ss:$0 sm:$0xff]  ;;  %v378_v16 = vld [vmem:[%s819_s4 + $0x1] ss:$0 sm:$0xff] }
  0x4e   :  { %407 = vmatprep.subr.bf16.mxu0 %v617_v0  ;;  %415 = vmatprep.subr.bf16.mxu1 %v617_v0  ;;  %s326_s8 = sshll.u32 %s619_s30, 4  ;;  %s620_s9 = smov [#allocation11]   ;;  %s327_s8 = int_to_ptr.vmem [resolvable:$true] %s326_s8 }
  0x4f   :  { %s338_s10 = sshll.u32 %s620_s9, 4  ;;  %s535_s11 = scalar_lea.vmem %s327_s8, 128  ;;  %s757_s10 = int_to_ptr.vmem [resolvable:$true] %s338_s10 }
  0x50   :  { %p536_p4 = scmp.ne.s32.totalorder %s327_s8, %s535_s11  ;;  %p540_p5 = scmp.lt.s32.totalorder %s327_s8, %s327_s8 }
  0x51   :  { %p541_p6 = scmp.lt.s32.totalorder %s535_s11, %s535_s11 }
  0x53   :  { %p542_p7 = por %p541_p6, %p540_p5 }
  0x55   :  { %408 = vmatpush3.bf16.xpose.msra.mxu0 %v115_v7  ;;  %416 = vmatpush3.bf16.xpose.msra.mxu1 %v192_v8  ;;  %p543_p8 = pnand %p542_p7, %p536_p4 }
  0x56   :  { %421 = vmatprep.subr.bf16.mxu0 %v617_v0 }
  0x5c   :  { %410 = vmatmul.mubr.msk.bf16.vlgmr.msra.gmra.mrb[0].mxu0 %vm107_vm1, %v443_v10  ;;  %418 = vmatmul.mubr.msk.bf16.vlgmr.msra.gmra.mrb[0].mxu1 %vm107_vm1, %v443_v10 }
  0x5d   :  { %422 = vmatpush3.bf16.xpose.msra.mxu0 %v265_v11  ;;  %425 = vmatprep.mubr.msk.bf16.mxu0 %vm618_vm0, %v617_v0 }
  0x5e   :  { %423 = vmatprep.subr.bf16.mxu0 %v617_v0 }
  0x65   :  { %424 = vmatpush3.bf16.xpose.msra.mxu0 %v268_v13 }
  0x6c   :  { %426 = vmatmul.mubr.msk.bf16.vlgmr.msra.gmra.mrb[4].mxu0 %vm107_vm1, %v443_v10 }
 0x12f   :  { %v151_v15 = vpop.f32.mrb[0].mxu0  ;;  %v228_v20 = vpop.f32.mrb[0].mxu1 }
 0x130   :  { %v152_v17 = vadd.f32 %v371_v14, %v151_v15  ;;  %v411_v18 = vpop.f32.mrb[1].mxu0  ;;  %v229_v24 = vadd.f32 %v378_v16, %v228_v20  ;;  %v419_v25 = vpop.f32.mrb[1].mxu1 }
 0x131   :  { %v154_v19 = vpop.f32.mrb[2].mxu0  ;;  %v231_v26 = vpop.f32.mrb[2].mxu1 }
 0x132   :  { %v390_v21 = vpack.c.bf16 %v152_v17, %v152_v17  ;;  %v155_v22 = vadd.f32 %v371_v14, %v154_v19  ;;  %v412_v23 = vpop.f32.mrb[3].mxu0  ;;  %v392_v28 = vpack.c.bf16 %v229_v24, %v229_v24  ;;  %v232_v29 = vadd.f32 %v378_v16, %v231_v26  ;;  %v420_v30 = vpop.f32.mrb[3].mxu1 }
 0x134   :  { %v391_v27 = vpack.c.bf16 %v155_v22, %v155_v22  ;;  %167 = vst.msk [vmem:[#allocation10] sm:$0xf] %vm166_vm2, %v390_v21  ;;  %v393_v31 = vpack.c.bf16 %v232_v29, %v232_v29  ;;  %243 = vst.msk [vmem:[#allocation11] sm:$0xf] %vm166_vm2, %v392_v28 }
 0x136   :  { %168 = vst.msk [vmem:[#allocation10 + $0x4] sm:$0xf] %vm166_vm2, %v391_v27 }
 0x137   :  { %546 = shalt.err (!%p543_p8)
}
 0x138   :  { %s547_s16 = scalar_lea.hbm %s820_s5, 128 }
 0x139   :  { %p548_p9 = scmp.ne.s32.totalorder %s820_s5, %s547_s16  ;;  %p551_p10 = scmp.lt.u32.totalorder %s547_s16, %s820_s5 }
 0x13b   :  { %p553_p11 = pnand %p551_p10, %p548_p9 }
 0x13d   :  { %556 = shalt.err (!%p553_p11)
}
 0x13e   :  { %332 = dma.vmem_to_hbm [thread:$0]  %s327_s8, 128, %s820_s5, [#allocation4], %s613_s13, %s613_s13, %s614_s14   ;;  %244 = vst.msk [vmem:[#allocation11 + $0x4] sm:$0xf] %vm166_vm2, %v393_v31 }
 0x13f   :  { %s557_s21 = scalar_lea.vmem %s757_s10, 128  ;;  %p562_p13 = scmp.lt.s32.totalorder %s757_s10, %s757_s10 }
 0x140   :  { %p558_p12 = scmp.ne.s32.totalorder %s757_s10, %s557_s21  ;;  %p563_p0 = scmp.lt.s32.totalorder %s557_s21, %s557_s21 }
 0x142   :  { %p564_p1 = por %p563_p0, %p562_p13 }
 0x144   :  { %p565_p2 = pnand %p564_p1, %p558_p12 }
 0x146   :  { %568 = shalt.err (!%p565_p2)
}
 0x147   :  { %s569_s24 = scalar_lea.hbm %s821_s6, 128 }
 0x148   :  { %p570_p3 = scmp.ne.s32.totalorder %s821_s6, %s569_s24  ;;  %p573_p4 = scmp.lt.u32.totalorder %s569_s24, %s821_s6 }
 0x14a   :  { %p575_p5 = pnand %p573_p4, %p570_p3 }
 0x14c   :  { %578 = shalt.err (!%p575_p5)
}
 0x14d   :  { %344 = dma.vmem_to_hbm [thread:$0]  %s757_s10, 128, %s821_s6, [#allocation12], %s613_s13, %s613_s13, %s614_s14   ;;  %v304_v33 = vpop.f32.mrb[4].mxu0 }
 0x14e   :  { %v384_v32 = vld [vmem:[%s819_s4 + $0x2] ss:$0 sm:$0xff]  ;;  %v427_v35 = vpop.f32.mrb[5].mxu0  ;;  %s621_s30 = smov [#allocation13]  }
 0x14f   :  { %v305_v34 = vadd.f32 %v384_v32, %v304_v33  ;;  %v307_v36 = vpop.f32.mrb[6].mxu0  ;;  %s350_s8 = sshll.u32 %s621_s30, 4  ;;  %s351_s8 = int_to_ptr.vmem [resolvable:$true] %s350_s8 }
 0x150   :  { %v308_v38 = vadd.f32 %v384_v32, %v307_v36  ;;  %v428_v39 = vpop.f32.mrb[7].mxu0  ;;  %s579_s6 = scalar_lea.vmem %s351_s8, 128  ;;  %p584_p7 = scmp.lt.s32.totalorder %s351_s8, %s351_s8 }
 0x151   :  { %v394_v37 = vpack.c.bf16 %v305_v34, %v305_v34  ;;  %p580_p6 = scmp.ne.s32.totalorder %s351_s8, %s579_s6  ;;  %p585_p8 = scmp.lt.s32.totalorder %s579_s6, %s579_s6 }
 0x152   :  { %v395_v40 = vpack.c.bf16 %v308_v38, %v308_v38 }
 0x153   :  { %319 = vst.msk [vmem:[#allocation13] sm:$0xf] %vm166_vm2, %v394_v37  ;;  %p586_p9 = por %p585_p8, %p584_p7 }
 0x154   :  { %320 = vst.msk [vmem:[#allocation13 + $0x4] sm:$0xf] %vm166_vm2, %v395_v40 }
 0x155   :  { %p587_p10 = pnand %p586_p9, %p580_p6 }
 0x157   :  { %590 = shalt.err (!%p587_p10)
}
 0x158   :  { %s591_s10 = scalar_lea.hbm %s822_s7, 128 }
 0x159   :  { %p592_p11 = scmp.ne.s32.totalorder %s822_s7, %s591_s10  ;;  %p595_p12 = scmp.lt.u32.totalorder %s591_s10, %s822_s7 }
 0x15b   :  { %p597_p13 = pnand %p595_p12, %p592_p11 }
 0x15d   :  { %600 = shalt.err (!%p597_p13)
}
 0x15e   :  { %356 = dma.vmem_to_hbm [thread:$0]  %s351_s8, 128, %s822_s7, [#allocation12], %s613_s13, %s613_s13, %s614_s14  }
 0x15f   :  { %607 = dma.done.wait [#allocation4], 128  }
 0x160   :  { %608 = vsyncadd [#allocation4], 4294967168 }
 0x161   :  { %609 = dma.done.wait [#allocation12], 256  }
 0x162   :  { %610 = vsyncadd [#allocation12], 4294967040 }
 0x163   :  { %366 = vsyncpa [#allocation3], 1 }
 0x164   :  { %367 = vsyncpa [#allocation6], 1 }
 0x165   :  { %368 = vsyncpa [#allocation9], 1 }
 0x166   :  { %369 = vsyncpa [#allocation4], 1 }
 0x167   :  { %370 = vsyncpa [#allocation12], 1 }

</bundles_post_ra>
